<compile_context>
chip_gen: v7x
topology: tpu7x:2x2x1
jax: 0.10.0
libtpu: 0.0.40
codegen_flags: <defaults>
</compile_context>

<pallas_src>
import functools

import jax
import jax.numpy as jnp
from jax.experimental import pallas as pl
from jax.experimental.pallas import tpu as pltpu

_LANE = 128
_SUBLANE = 8


def _mlp_kernel(x_ref, w1_ref, b1_ref, w2_ref, b2_ref, w3_ref, b3_ref, out_ref,
                *, compute_dtype):
    x = x_ref[...].astype(compute_dtype)

    # layer1 + tanh  (MXU in compute_dtype, f32 accumulation, f32 bias/tanh)
    h1 = jnp.tanh(
        jnp.dot(x, w1_ref[...].astype(compute_dtype),
                preferred_element_type=jnp.float32) + b1_ref[...])

    # layer2 + tanh
    h2 = jnp.tanh(
        jnp.dot(h1.astype(compute_dtype), w2_ref[...].astype(compute_dtype),
                preferred_element_type=jnp.float32) + b2_ref[...])

    # layer3 (no activation); output block is lane-dense (padded to 128 cols)
    out_ref[...] = (
        jnp.dot(h2.astype(compute_dtype), w3_ref[...].astype(compute_dtype),
                preferred_element_type=jnp.float32) + b3_ref[...]
    ).astype(out_ref.dtype)


def feedforward_nn(obs, params, *, block_b=1024, compute_dtype=jnp.float32):
    """obs: (B, N_input) float32.  params: dict of W1,b1,W2,b2,W3,b3."""
    w1, b1 = params["W1"], params["b1"]
    w2, b2 = params["W2"], params["b2"]
    w3, b3 = params["W3"], params["b3"]

    B, n_in = obs.shape
    hidden = w1.shape[1]
    n_out = w3.shape[1]

    # ---- lane-dense output: zero-pad layer-3 to a multiple of 128 columns ----
    n_out_p = max(_LANE, ((n_out + _LANE - 1) // _LANE) * _LANE)
    if n_out_p != n_out:
        w3 = jnp.pad(w3, ((0, 0), (0, n_out_p - n_out)))
        b3 = jnp.pad(b3, ((0, 0), (0, n_out_p - n_out)))

    # ---- batch tiling: pad B to a sublane multiple, tile with TB rows ----
    B_p = ((B + _SUBLANE - 1) // _SUBLANE) * _SUBLANE
    if B_p != B:
        obs = jnp.pad(obs, ((0, B_p - B), (0, 0)))
    tb = min(block_b, B_p)
    tb = max(_SUBLANE, (tb // _SUBLANE) * _SUBLANE)
    grid = (pl.cdiv(B_p, tb),)

    # Advisory cost estimate so XLA can overlap this call with neighbours.
    flops = 2 * B_p * (n_in * hidden + hidden * hidden + hidden * n_out_p)
    transcendentals = 2 * B_p * hidden  # two tanh layers
    bytes_accessed = 4 * (B_p * n_in + B_p * n_out_p
                          + w1.size + b1.size + w2.size + b2.size
                          + w3.size + b3.size)

    # Weights/biases: full block, constant block index -> DMA'd once, resident.
    def resident(arr):
        return pl.BlockSpec(arr.shape, lambda i: (0, 0))

    out_padded = pl.pallas_call(
        functools.partial(_mlp_kernel, compute_dtype=compute_dtype),
        out_shape=jax.ShapeDtypeStruct((B_p, n_out_p), jnp.float32),
        grid=grid,
        in_specs=[
            pl.BlockSpec((tb, n_in), lambda i: (i, 0)),   # obs: tiled on batch
            resident(w1), resident(b1),
            resident(w2), resident(b2),
            resident(w3), resident(b3),
        ],
        out_specs=pl.BlockSpec((tb, n_out_p), lambda i: (i, 0)),
        compiler_params=pltpu.CompilerParams(
            dimension_semantics=("parallel",),   # megacore sharding on v7x
            vmem_limit_bytes=32 << 20,           # safe on v5e/v6e/v7x
        ),
        cost_estimate=pl.CostEstimate(
            flops=flops,
            transcendentals=transcendentals,
            bytes_accessed=bytes_accessed),
    )(obs, w1, b1, w2, b2, w3, b3)

    return out_padded[:B, :n_out]


def init_params(key, n_input, n_output, largeur):
    """Deterministic init mimicking PyTorch nn.Linear default (U[-1/sqrt(fan_in), +])."""
    ks = jax.random.split(key, 6)

    def linear(kw, kb, fan_in, fan_out):
        bound = 1.0 / jnp.sqrt(jnp.float32(fan_in))
        W = jax.random.uniform(kw, (fan_in, fan_out), jnp.float32, -bound, bound)
        b = jax.random.uniform(kb, (1, fan_out), jnp.float32, -bound, bound)
        return W, b

    W1, b1 = linear(ks[0], ks[1], n_input, largeur)
    W2, b2 = linear(ks[2], ks[3], largeur, largeur)
    W3, b3 = linear(ks[4], ks[5], largeur, n_output)
    return {"W1": W1, "b1": b1, "W2": W2, "b2": b2, "W3": W3, "b3": b3}


def _reference(obs, p):
    h1 = jnp.tanh(obs @ p["W1"] + p["b1"])
    h2 = jnp.tanh(h1 @ p["W2"] + p["b2"])
    return h2 @ p["W3"] + p["b3"]


if __name__ == "__main__":
    key = jax.random.PRNGKey(0)
    k_obs, k_par = jax.random.split(key)

    N_input, N_output, Largeur = 8, 4, 32
    batch = 8

    obs = jax.random.normal(k_obs, (batch, N_input), dtype=jnp.float32)
    params = init_params(k_par, N_input, N_output, Largeur)
    ref = _reference(obs, params)

    # f32 MXU path: matches the pure-f32 reference tightly.
    out = feedforward_nn(obs, params)
    jax.block_until_ready(out)
    assert out.shape == (batch, N_output)
    assert jnp.allclose(out, ref, atol=1e-5, rtol=1e-5)

    # bf16 MXU path (f32 accumulation, f32 tanh/bias): looser tolerance.
    out_bf16 = feedforward_nn(obs, params, compute_dtype=jnp.bfloat16)
    jax.block_until_ready(out_bf16)
    assert out_bf16.shape == (batch, N_output)
    assert jnp.allclose(out_bf16, ref, atol=5e-2, rtol=5e-2)

    print("KERNEL_OK")
</pallas_src>

<mosaic_0001>
module attributes {stable_mosaic.version = 11 : i64} {
  func.func @_mlp_kernel(%arg0: i32, %arg1: memref<8x8xf32, #tpu.memory_space<vmem>>, %arg2: memref<8x32xf32, #tpu.memory_space<vmem>>, %arg3: memref<1x32xf32, #tpu.memory_space<vmem>>, %arg4: memref<32x32xf32, #tpu.memory_space<vmem>>, %arg5: memref<1x32xf32, #tpu.memory_space<vmem>>, %arg6: memref<32x128xf32, #tpu.memory_space<vmem>>, %arg7: memref<1x128xf32, #tpu.memory_space<vmem>>, %arg8: memref<8x128xf32, #tpu.memory_space<vmem>>) attributes {dimension_semantics = [#tpu.dimension_semantics<parallel>], iteration_bounds = array<i64: 1>, scalar_prefetch = 0 : i64, scratch_operands = 0 : i64, tpu.core_type = #tpu.core_type<tc>, window_params = [{transform_indices = @transform_0, window_bounds = array<i64: 8, 8>}, {pipeline_mode = #tpu.pipeline_mode<synchronous>, transform_indices = @transform_1, window_bounds = array<i64: 8, 32>}, {pipeline_mode = #tpu.pipeline_mode<synchronous>, transform_indices = @transform_2, window_bounds = array<i64: 1, 32>}, {pipeline_mode = #tpu.pipeline_mode<synchronous>, transform_indices = @transform_3, window_bounds = array<i64: 32, 32>}, {pipeline_mode = #tpu.pipeline_mode<synchronous>, transform_indices = @transform_4, window_bounds = array<i64: 1, 32>}, {pipeline_mode = #tpu.pipeline_mode<synchronous>, transform_indices = @transform_5, window_bounds = array<i64: 32, 128>}, {pipeline_mode = #tpu.pipeline_mode<synchronous>, transform_indices = @transform_6, window_bounds = array<i64: 1, 128>}, {transform_indices = @transform_7, window_bounds = array<i64: 8, 128>}]} {
    %c0 = arith.constant 0 : index
    %c0_0 = arith.constant 0 : index
    %0 = vector.load %arg1[%c0, %c0_0] : memref<8x8xf32, #tpu.memory_space<vmem>>, vector<8x8xf32>
    %c0_1 = arith.constant 0 : index
    %c0_2 = arith.constant 0 : index
    %1 = vector.load %arg2[%c0_1, %c0_2] : memref<8x32xf32, #tpu.memory_space<vmem>>, vector<8x32xf32>
    %cst = arith.constant dense<0.000000e+00> : vector<8x32xf32>
    %2 = tpu.matmul %0, %1, %cst {dimension_numbers = #tpu.dot_dimension_numbers<[1], [0], [0], [1], [0, 0, 1, 1], [], []>} : vector<8x8xf32>, vector<8x32xf32>, vector<8x32xf32> -> vector<8x32xf32>
    %c0_3 = arith.constant 0 : index
    %c0_4 = arith.constant 0 : index
    %3 = vector.load %arg3[%c0_3, %c0_4] : memref<1x32xf32, #tpu.memory_space<vmem>>, vector<1x32xf32>
    %4 = vector.broadcast %3 : vector<1x32xf32> to vector<8x32xf32>
    %5 = arith.addf %2, %4 : vector<8x32xf32>
    %6 = math.tanh %5 : vector<8x32xf32>
    %c0_5 = arith.constant 0 : index
    %c0_6 = arith.constant 0 : index
    %7 = vector.load %arg4[%c0_5, %c0_6] : memref<32x32xf32, #tpu.memory_space<vmem>>, vector<32x32xf32>
    %cst_7 = arith.constant dense<0.000000e+00> : vector<8x32xf32>
    %8 = tpu.matmul %6, %7, %cst_7 {dimension_numbers = #tpu.dot_dimension_numbers<[1], [0], [0], [1], [0, 0, 1, 1], [], []>} : vector<8x32xf32>, vector<32x32xf32>, vector<8x32xf32> -> vector<8x32xf32>
    %c0_8 = arith.constant 0 : index
    %c0_9 = arith.constant 0 : index
    %9 = vector.load %arg5[%c0_8, %c0_9] : memref<1x32xf32, #tpu.memory_space<vmem>>, vector<1x32xf32>
    %10 = vector.broadcast %9 : vector<1x32xf32> to vector<8x32xf32>
    %11 = arith.addf %8, %10 : vector<8x32xf32>
    %12 = math.tanh %11 : vector<8x32xf32>
    %c0_10 = arith.constant 0 : index
    %c0_11 = arith.constant 0 : index
    %13 = vector.load %arg6[%c0_10, %c0_11] : memref<32x128xf32, #tpu.memory_space<vmem>>, vector<32x128xf32>
    %cst_12 = arith.constant dense<0.000000e+00> : vector<8x128xf32>
    %14 = tpu.matmul %12, %13, %cst_12 {dimension_numbers = #tpu.dot_dimension_numbers<[1], [0], [0], [1], [0, 0, 1, 1], [], []>} : vector<8x32xf32>, vector<32x128xf32>, vector<8x128xf32> -> vector<8x128xf32>
    %c0_13 = arith.constant 0 : index
    %c0_14 = arith.constant 0 : index
    %15 = vector.load %arg7[%c0_13, %c0_14] : memref<1x128xf32, #tpu.memory_space<vmem>>, vector<1x128xf32>
    %16 = vector.broadcast %15 : vector<1x128xf32> to vector<8x128xf32>
    %17 = arith.addf %14, %16 : vector<8x128xf32>
    %c0_15 = arith.constant 0 : index
    %c0_16 = arith.constant 0 : index
    %18 = vector.load %arg8[%c0_15, %c0_16] : memref<8x128xf32, #tpu.memory_space<vmem>>, vector<8x128xf32>
    tpu.vector_store %arg8[%c0_15, %c0_16], %17 {strides = array<i32>} : memref<8x128xf32, #tpu.memory_space<vmem>>, vector<8x128xf32>,
    return
  }
  func.func @transform_0(%arg0: i32) -> (i32, i32) {
    %c0_i32 = arith.constant 0 : i32
    %c0_i32_0 = arith.constant 0 : i32
    return %arg0, %c0_i32 : i32, i32
  }
  func.func @transform_1(%arg0: i32) -> (i32, i32) {
    %c0_i32 = arith.constant 0 : i32
    %c0_i32_0 = arith.constant 0 : i32
    %c0_i32_1 = arith.constant 0 : i32
    return %c0_i32, %c0_i32_0 : i32, i32
  }
  func.func @transform_2(%arg0: i32) -> (i32, i32) {
    %c0_i32 = arith.constant 0 : i32
    %c0_i32_0 = arith.constant 0 : i32
    %c0_i32_1 = arith.constant 0 : i32
    return %c0_i32, %c0_i32_0 : i32, i32
  }
  func.func @transform_3(%arg0: i32) -> (i32, i32) {
    %c0_i32 = arith.constant 0 : i32
    %c0_i32_0 = arith.constant 0 : i32
    %c0_i32_1 = arith.constant 0 : i32
    return %c0_i32, %c0_i32_0 : i32, i32
  }
  func.func @transform_4(%arg0: i32) -> (i32, i32) {
    %c0_i32 = arith.constant 0 : i32
    %c0_i32_0 = arith.constant 0 : i32
    %c0_i32_1 = arith.constant 0 : i32
    return %c0_i32, %c0_i32_0 : i32, i32
  }
  func.func @transform_5(%arg0: i32) -> (i32, i32) {
    %c0_i32 = arith.constant 0 : i32
    %c0_i32_0 = arith.constant 0 : i32
    %c0_i32_1 = arith.constant 0 : i32
    return %c0_i32, %c0_i32_0 : i32, i32
  }
  func.func @transform_6(%arg0: i32) -> (i32, i32) {
    %c0_i32 = arith.constant 0 : i32
    %c0_i32_0 = arith.constant 0 : i32
    %c0_i32_1 = arith.constant 0 : i32
    return %c0_i32, %c0_i32_0 : i32, i32
  }
  func.func @transform_7(%arg0: i32) -> (i32, i32) {
    %c0_i32 = arith.constant 0 : i32
    %c0_i32_0 = arith.constant 0 : i32
    return %arg0, %c0_i32 : i32, i32
  }
}

</mosaic_0001>

<bundles_post_ra>
// kernel: tpu_custom_call.1
= control target key start
LH: loop header
LB: loop body
LE: loop exit
PB: predicated region body
PF: predicated region fallthrough
CT: control target
= control target key end

     0   :  { %12 = vsyncpa [#allocation3], 0  ;;  %s660_s0 = inlined_call_operand.hbm [shape: f32[8,8], index: 0, kind: input, shape index: {}]   ;;  %s661_s1 = inlined_call_operand.hbm [shape: f32[8,32], index: 1, kind: input, shape index: {}]   ;;  %s662_s2 = inlined_call_operand.vmem [shape: f32[1,32], index: 2, kind: input, shape index: {}]   ;;  %s663_s3 = inlined_call_operand.hbm [shape: f32[32,32], index: 3, kind: input, shape index: {}]   ;;  %s664_s4 = inlined_call_operand.vmem [shape: f32[1,32], index: 4, kind: input, shape index: {}]   ;;  %s665_s5 = inlined_call_operand.hbm [shape: f32[32,128], index: 5, kind: input, shape index: {}]   ;;  %s666_s6 = inlined_call_operand.vmem [shape: f32[1,128], index: 6, kind: input, shape index: {}]   ;;  %s667_s7 = inlined_call_operand.hbm [shape: f32[8,128], index: 7, kind: output, shape index: {}]  }
   0x1   :  { %13 = vsyncpa [#allocation6], 0 }
   0x2   :  { %14 = vsyncpa [#allocation9], 0 }
   0x3   :  { %15 = vsyncpa [#allocation4], 0  ;;  %s539_s24 = smov [#allocation5]   ;;  %s540_s26 = smov [#allocation2]  }
   0x4   :  { %s32_s25 = sshll.u32 %s539_s24, 4  ;;  %s22_s27 = sshll.u32 %s540_s26, 4  ;;  %s33_s25 = int_to_ptr.vmem [resolvable:$true] %s32_s25  ;;  %s23_s27 = int_to_ptr.vmem [resolvable:$true] %s22_s27 }
   0x5   :  { %s421_s30 = scalar_lea.hbm %s661_s1, 128 }
   0x6   :  { %p422_p0 = scmp.ne.s32.totalorder %s661_s1, %s421_s30  ;;  %p425_p1 = scmp.lt.u32.totalorder %s421_s30, %s661_s1 }
   0x8   :  { %p427_p2 = pnand %p425_p1, %p422_p0 }
   0xa   :  { %430 = shalt.err (!%p427_p2)
}
   0xb   :  { %s431_s12 = scalar_lea.vmem %s33_s25, 128  ;;  %p436_p4 = scmp.lt.s32.totalorder %s33_s25, %s33_s25 }
   0xc   :  { %p432_p3 = scmp.ne.s32.totalorder %s33_s25, %s431_s12  ;;  %p437_p5 = scmp.lt.s32.totalorder %s431_s12, %s431_s12 }
   0xe   :  { %p438_p6 = por %p437_p5, %p436_p4 }
  0x10   :  { %p439_p7 = pnand %p438_p6, %p432_p3 }
  0x12   :  { %442 = shalt.err (!%p439_p7)
}
  0x13   :  { %35 = dma.hbm_to_vmem [thread:$0]  %s661_s1, 128, %s33_s25, [#allocation6]  }
  0x14   :  { %s443_s17 = scalar_lea.hbm %s660_s0, 128 }
  0x15   :  { %p444_p8 = scmp.ne.s32.totalorder %s660_s0, %s443_s17  ;;  %p447_p9 = scmp.lt.u32.totalorder %s443_s17, %s660_s0 }
  0x17   :  { %p449_p10 = pnand %p447_p9, %p444_p8 }
  0x19   :  { %452 = shalt.err (!%p449_p10)
}
  0x1a   :  { %s453_s22 = scalar_lea.vmem %s23_s27, 128  ;;  %p458_p12 = scmp.lt.s32.totalorder %s23_s27, %s23_s27 }
  0x1b   :  { %p454_p11 = scmp.ne.s32.totalorder %s23_s27, %s453_s22  ;;  %p459_p13 = scmp.lt.s32.totalorder %s453_s22, %s453_s22 }
  0x1d   :  { %p460_p0 = por %p459_p13, %p458_p12 }
  0x1f   :  { %p461_p1 = pnand %p460_p0, %p454_p11 }
  0x21   :  { %464 = shalt.err (!%p461_p1)
}
  0x22   :  { %25 = dma.hbm_to_vmem [thread:$0]  %s660_s0, 128, %s23_s27, [#allocation3]  }
  0x23   :  { %s541_s24 = smov [#allocation7]   ;;  %s465_s29 = scalar_lea.hbm %s663_s3, 512 }
  0x24   :  { %s43_s25 = sshll.u32 %s541_s24, 4  ;;  %p466_p2 = scmp.ne.s32.totalorder %s663_s3, %s465_s29  ;;  %s44_s25 = int_to_ptr.vmem [resolvable:$true] %s43_s25 }
  0x25   :  { %p469_p3 = scmp.lt.u32.totalorder %s465_s29, %s663_s3 }
  0x27   :  { %p471_p4 = pnand %p469_p3, %p466_p2 }
  0x29   :  { %474 = shalt.err (!%p471_p4)
}
  0x2a   :  { %s475_s11 = scalar_lea.vmem %s44_s25, 512  ;;  %p480_p6 = scmp.lt.s32.totalorder %s44_s25, %s44_s25 }
  0x2b   :  { %p476_p5 = scmp.ne.s32.totalorder %s44_s25, %s475_s11  ;;  %p481_p7 = scmp.lt.s32.totalorder %s475_s11, %s475_s11 }
  0x2d   :  { %p482_p8 = por %p481_p7, %p480_p6 }
  0x2f   :  { %p483_p9 = pnand %p482_p8, %p476_p5 }
  0x31   :  { %486 = shalt.err (!%p483_p9)
}
  0x32   :  { %s542_s0 = smov 128   ;;  %s543_s27 = smov 8  }
  0x33   :  { %49 = dma.hbm_to_vmem [thread:$0]  %s663_s3, 512, %s44_s25, [#allocation6], %s542_s0, %s542_s0, %s543_s27  }
  0x34   :  { %s544_s14 = smov [#allocation8]   ;;  %s487_s18 = scalar_lea.hbm %s665_s5, 512 }
  0x35   :  { %s57_s15 = sshll.u32 %s544_s14, 4  ;;  %p488_p10 = scmp.ne.s32.totalorder %s665_s5, %s487_s18  ;;  %s58_s15 = int_to_ptr.vmem [resolvable:$true] %s57_s15 }
  0x36   :  { %p491_p11 = scmp.lt.u32.totalorder %s487_s18, %s665_s5 }
  0x38   :  { %p493_p12 = pnand %p491_p11, %p488_p10 }
  0x3a   :  { %496 = shalt.err (!%p493_p12)
}
  0x3b   :  { %s497_s1 = scalar_lea.vmem %s58_s15, 512  ;;  %p502_p0 = scmp.lt.s32.totalorder %s58_s15, %s58_s15 }
  0x3c   :  { %p498_p13 = scmp.ne.s32.totalorder %s58_s15, %s497_s1  ;;  %p503_p1 = scmp.lt.s32.totalorder %s497_s1, %s497_s1 }
  0x3e   :  { %p504_p2 = por %p503_p1, %p502_p0 }
  0x40   :  { %p505_p3 = pnand %p504_p2, %p498_p13 }
  0x42   :  { %508 = shalt.err (!%p505_p3)
}
  0x43   :  { %63 = dma.hbm_to_vmem [thread:$0]  %s665_s5, 512, %s58_s15, [#allocation9], %s542_s0, %s542_s0, %s543_s27  }
  0x44   :  { %531 = dma.done.wait [#allocation3], 128  }
  0x45   :  { %532 = vsyncadd [#allocation3], 4294967168 }
  0x46   :  { %533 = dma.done.wait [#allocation6], 640  }
  0x47   :  { %534 = vsyncadd [#allocation6], 4294966656 }
  0x48   :  { %535 = dma.done.wait [#allocation9], 512  }
  0x49   :  { %536 = vsyncadd [#allocation9], 4294966784  ;;  %v545_v0 = vmov 0.0   ;;  %vm546_vm0 = vmmov 0   ;;  %vm87_vm1 = vcmask 64512   ;;  %v79_v1 = vld [vmem:[#allocation5] sm:$0xff] }
  0x4a   :  { %368 = vmatprep.subr.mxu0 %v545_v0  ;;  %370 = vmatprep.mubr.msk.f32.mxu0 %vm546_vm0, %v545_v0  ;;  %v78_v2 = vld [vmem:[#allocation2] sm:$0xff]  ;;  %v162_v3 = vld [vmem:[#allocation7] sm:$0xff]  ;;  %v163_v4 = vld [vmem:[#allocation7 + $0x8] sm:$0xff]  ;;  %v547_v6 = vmov 0.0|0.0   ;;  %vm173_vm2 = vcmask 261120   ;;  %s548_s29 = smov [#allocation10]  }
  0x4b   :  { %381 = vmatprep.mubr.msk.f32.mxu1 %vm546_vm0, %v545_v0  ;;  %369 = vmatpush3.msra.mxu0 %v79_v1  ;;  %v164_v5 = vld [vmem:[#allocation7 + $0x10] sm:$0xff]  ;;  %v396_v7 = vpack.c.bf16 %v163_v4, %v162_v3  ;;  %v165_v8 = vld [vmem:[#allocation7 + $0x18] sm:$0xff]  ;;  %v248_v15 = vld [vmem:[#allocation8] sm:$0xff]  ;;  %s339_s30 = sshll.u32 %s548_s29, 4  ;;  %s340_s30 = int_to_ptr.vmem [resolvable:$true] %s339_s30 }
  0x4c   :  { %371 = vmatmul.mubr.msk.f32.vlgmr.msra.gmra.mrb[0].mxu0 %vm87_vm1, %v78_v2  ;;  %395 = vmatprep.subr.bf16.mxu1 %v547_v6  ;;  %v399_v9 = vpack.c.bf16 %v165_v8, %v164_v5  ;;  %v350_v10 = vld [vmem:[%s662_s2] ss:$0 sm:$0xff]  ;;  %v249_v16 = vld [vmem:[#allocation8 + $0x8] sm:$0xff]  ;;  %v251_v19 = vld [vmem:[#allocation8 + $0x18] sm:$0xff]  ;;  %s509_s8 = scalar_lea.vmem %s340_s30, 128  ;;  %p514_p5 = scmp.lt.s32.totalorder %s340_s30, %s340_s30 }
  0x4d   :  { %392 = vmatprep.mubr.msk.f32.mxu0 %vm546_vm0, %v545_v0  ;;  %401 = vmatprep.subr.bf16.mxu0 %v547_v6  ;;  %v250_v17 = vld [vmem:[#allocation8 + $0x10] sm:$0xff]  ;;  %v402_v18 = vpack.c.bf16 %v249_v16, %v248_v15  ;;  %p510_p4 = scmp.ne.s32.totalorder %s340_s30, %s509_s8  ;;  %p515_p6 = scmp.lt.s32.totalorder %s509_s8, %s509_s8 }
  0x4e   :  { %397 = vmatpush3.bf16.msra.mxu1 %v396_v7  ;;  %v405_v20 = vpack.c.bf16 %v251_v19, %v250_v17  ;;  %v352_v21 = vld [vmem:[%s664_s4] ss:$0 sm:$0xff] }
  0x4f   :  { %398 = vmatprep.subr.bf16.mxu1 %v547_v6  ;;  %403 = vmatpush3.bf16.msra.mxu0 %v402_v18  ;;  %v354_v26 = vld [vmem:[%s666_s6] ss:$0 sm:$0xff]  ;;  %p516_p7 = por %p515_p6, %p514_p5 }
  0x50   :  { %404 = vmatprep.subr.bf16.mxu0 %v547_v6 }
  0x51   :  { %p517_p8 = pnand %p516_p7, %p510_p4 }
  0x52   :  { %400 = vmatpush3.bf16.msra.mxu1 %v399_v9 }
  0x53   :  { %406 = vmatpush3.bf16.msra.mxu0 %v405_v20 }
 0x11f   :  { %v157_v11 = vpop.f32.mrb[0].mxu0 }
 0x120   :  { %v158_v12 = vadd.f32 %v350_v10, %v157_v11  ;;  %v372_v13 = vpop.f32.mrb[1].mxu0 }
 0x122   :  { %417 = vtanh.f32 %v158_v12 }
 0x12c   :  { %v418_v14 = vpop.eup %417 }
 0x12d   :  { %382 = vmatmul.mubr.msk.f32.vlgmr.msra.gmra.mrb[0].mxu1 %vm173_vm2, %v418_v14 }
 0x200   :  { %v243_v22 = vpop.f32.mrb[0].mxu1 }
 0x201   :  { %v244_v23 = vadd.f32 %v352_v21, %v243_v22  ;;  %v383_v24 = vpop.f32.mrb[1].mxu1 }
 0x203   :  { %419 = vtanh.f32 %v244_v23 }
 0x20d   :  { %v420_v25 = vpop.eup %419 }
 0x20e   :  { %393 = vmatmul.mubr.msk.f32.vlgmr.msra.gmra.mrb[2].mxu0 %vm173_vm2, %v420_v25 }
 0x2e1   :  { %v328_v27 = vpop.f32.mrb[2].mxu0 }
 0x2e2   :  { %v329_v28 = vadd.f32 %v354_v26, %v328_v27  ;;  %v394_v29 = vpop.f32.mrb[3].mxu0 }
 0x2e4   :  { %332 = vst [vmem:[#allocation10] sm:$0xff] %v329_v28 }
 0x2e5   :  { %520 = shalt.err (!%p517_p8)
}
 0x2e6   :  { %s521_s10 = scalar_lea.hbm %s667_s7, 128 }
 0x2e7   :  { %p522_p9 = scmp.ne.s32.totalorder %s667_s7, %s521_s10  ;;  %p525_p10 = scmp.lt.u32.totalorder %s521_s10, %s667_s7 }
 0x2e9   :  { %p527_p11 = pnand %p525_p10, %p522_p9 }
 0x2eb   :  { %530 = shalt.err (!%p527_p11)
}
 0x2ec   :  { %342 = dma.vmem_to_hbm [thread:$0]  %s340_s30, 128, %s667_s7, [#allocation4]  }
 0x2ed   :  { %537 = dma.done.wait [#allocation4], 128  }
 0x2ee   :  { %538 = vsyncadd [#allocation4], 4294967168 }
 0x2ef   :  { %346 = vsyncpa [#allocation3], 1 }
 0x2f0   :  { %347 = vsyncpa [#allocation6], 1 }
 0x2f1   :  { %348 = vsyncpa [#allocation9], 1 }
 0x2f2   :  { %349 = vsyncpa [#allocation4], 1 }

</bundles_post_ra>
